<compile_context>
chip_gen: v7x
topology: tpu7x:2x2x1
jax: 0.10.0
libtpu: 0.0.40
codegen_flags: <defaults>
</compile_context>

<pallas_src>
import jax
import jax.numpy as jnp
from jax.experimental import pallas as pl
from jax.experimental.pallas import tpu as pltpu


# ---------------------------------------------------------------------------
# Fused kernel: Linear + BatchNorm1d(training) + ReLU, all in VMEM.
# ---------------------------------------------------------------------------
def mlp_bn_relu_kernel(x_ref, w_ref, b_ref, g_ref, beta_ref, o_ref):
    # x: (N, D_in)   w: (D_in, H)   b/g/beta: (1, H)   o: (N, H)
    x = x_ref[...]
    h = jnp.dot(x, w_ref[...], preferred_element_type=jnp.float32) + b_ref[...]

    # One-pass batch statistics over the batch axis (biased variance — the
    # normalization PyTorch uses in training mode).
    n = h.shape[0]
    inv_n = 1.0 / float(n)
    s = jnp.sum(h, axis=0, keepdims=True)               # (1, H)
    ss = jnp.sum(h * h, axis=0, keepdims=True)          # (1, H)
    mean = s * inv_n
    var = ss * inv_n - mean * mean
    inv_std = jax.lax.rsqrt(var + 1e-5)                 # EUP rsqrt

    # Fold gamma / beta / mean / inv_std into one per-column affine so the
    # full (N, H) tile only sees a multiply + add (+ ReLU max).
    scale = g_ref[...] * inv_std                        # (1, H)
    shift = beta_ref[...] - mean * scale                # (1, H)
    y = h * scale + shift
    o_ref[...] = jnp.maximum(y, 0.0)                    # ReLU


def _full_spec(shape):
    nd = len(shape)
    return pl.BlockSpec(shape, lambda i, _nd=nd: (0,) * _nd)


def net1_forward(params, x):
    """x: (N, input_size) -> (N, hidden_size). Single fused pallas_call."""
    w = params["w"]            # (input_size, hidden_size)  == W.T of PyTorch
    b = params["b"]            # (1, hidden_size)
    g = params["gamma"]        # (1, hidden_size)
    beta = params["beta"]      # (1, hidden_size)
    n, _ = x.shape
    hidden = w.shape[1]
    out_shape = (n, hidden)

    return pl.pallas_call(
        mlp_bn_relu_kernel,
        out_shape=jax.ShapeDtypeStruct(out_shape, jnp.float32),
        grid=(1,),
        in_specs=[_full_spec(x.shape), _full_spec(w.shape), _full_spec(b.shape),
                  _full_spec(g.shape), _full_spec(beta.shape)],
        out_specs=_full_spec(out_shape),
        compiler_params=pltpu.CompilerParams(
            dimension_semantics=("arbitrary",)),
    )(x, w, b, g, beta)


# ---------------------------------------------------------------------------
# Parameters (deterministic synthetic init; shapes match the PyTorch module)
# ---------------------------------------------------------------------------
def init_params(key, input_size, hidden_size):
    kw, kb = jax.random.split(key)
    bound = 1.0 / (input_size ** 0.5)
    return dict(
        # Stored transposed relative to PyTorch's (hidden, input) so the
        # kernel matmul needs no in-kernel transpose.
        w=jax.random.uniform(kw, (input_size, hidden_size), jnp.float32,
                             -bound, bound),
        b=jax.random.uniform(kb, (1, hidden_size), jnp.float32, -bound, bound),
        gamma=jnp.ones((1, hidden_size), jnp.float32),
        beta=jnp.zeros((1, hidden_size), jnp.float32),
    )


def _reference(params, x):
    # Pure-JAX reference (same training-mode BatchNorm semantics).
    h = x @ params["w"] + params["b"]
    mean = jnp.mean(h, axis=0, keepdims=True)
    var = jnp.mean((h - mean) ** 2, axis=0, keepdims=True)
    y = (h - mean) * jax.lax.rsqrt(var + 1e-5) * params["gamma"] + params["beta"]
    return jnp.maximum(y, 0.0)


if __name__ == "__main__":
    INPUT_SIZE = 32
    HIDDEN_SIZE = 128   # lane-dense output (full 128 lanes, no masked stores)
    BATCH = 8           # sublane-aligned

    key = jax.random.PRNGKey(0)
    pkey, xkey = jax.random.split(key)
    params = init_params(pkey, INPUT_SIZE, HIDDEN_SIZE)
    x = jax.random.normal(xkey, (BATCH, INPUT_SIZE), dtype=jnp.float32)

    out = jax.jit(net1_forward)(params, x)
    jax.block_until_ready(out)

    assert out.shape == (BATCH, HIDDEN_SIZE)
    assert bool(jnp.all(jnp.isfinite(out)))
    assert bool(jnp.all(out >= 0.0))
    ref = _reference(params, x)
    assert bool(jnp.allclose(out, ref, atol=1e-4, rtol=1e-4))
    print("KERNEL_OK")
</pallas_src>

<mosaic_0001>
module attributes {stable_mosaic.version = 11 : i64} {
  func.func @mlp_bn_relu_kernel(%arg0: i32, %arg1: memref<8x32xf32, #tpu.memory_space<vmem>>, %arg2: memref<32x128xf32, #tpu.memory_space<vmem>>, %arg3: memref<1x128xf32, #tpu.memory_space<vmem>>, %arg4: memref<1x128xf32, #tpu.memory_space<vmem>>, %arg5: memref<1x128xf32, #tpu.memory_space<vmem>>, %arg6: memref<8x128xf32, #tpu.memory_space<vmem>>) attributes {dimension_semantics = [#tpu.dimension_semantics<arbitrary>], iteration_bounds = array<i64: 1>, scalar_prefetch = 0 : i64, scratch_operands = 0 : i64, tpu.core_type = #tpu.core_type<tc>, window_params = [{pipeline_mode = #tpu.pipeline_mode<synchronous>, transform_indices = @transform_0, window_bounds = array<i64: 8, 32>}, {pipeline_mode = #tpu.pipeline_mode<synchronous>, transform_indices = @transform_1, window_bounds = array<i64: 32, 128>}, {pipeline_mode = #tpu.pipeline_mode<synchronous>, transform_indices = @transform_2, window_bounds = array<i64: 1, 128>}, {pipeline_mode = #tpu.pipeline_mode<synchronous>, transform_indices = @transform_3, window_bounds = array<i64: 1, 128>}, {pipeline_mode = #tpu.pipeline_mode<synchronous>, transform_indices = @transform_4, window_bounds = array<i64: 1, 128>}, {pipeline_mode = #tpu.pipeline_mode<synchronous>, transform_indices = @transform_5, window_bounds = array<i64: 8, 128>}]} {
    %c0 = arith.constant 0 : index
    %c0_0 = arith.constant 0 : index
    %0 = vector.load %arg1[%c0, %c0_0] : memref<8x32xf32, #tpu.memory_space<vmem>>, vector<8x32xf32>
    %c0_1 = arith.constant 0 : index
    %c0_2 = arith.constant 0 : index
    %1 = vector.load %arg2[%c0_1, %c0_2] : memref<32x128xf32, #tpu.memory_space<vmem>>, vector<32x128xf32>
    %cst = arith.constant dense<0.000000e+00> : vector<8x128xf32>
    %2 = tpu.matmul %0, %1, %cst {dimension_numbers = #tpu.dot_dimension_numbers<[1], [0], [0], [1], [0, 0, 1, 1], [], []>} : vector<8x32xf32>, vector<32x128xf32>, vector<8x128xf32> -> vector<8x128xf32>
    %c0_3 = arith.constant 0 : index
    %c0_4 = arith.constant 0 : index
    %3 = vector.load %arg3[%c0_3, %c0_4] : memref<1x128xf32, #tpu.memory_space<vmem>>, vector<1x128xf32>
    %4 = vector.broadcast %3 : vector<1x128xf32> to vector<8x128xf32>
    %5 = arith.addf %2, %4 : vector<8x128xf32>
    %cst_5 = arith.constant dense<0.000000e+00> : vector<128xf32>
    %6 = vector.multi_reduction <add>, %5, %cst_5 [0] : vector<8x128xf32> to vector<128xf32>
    %7 = vector.shape_cast %6 : vector<128xf32> to vector<1x128xf32>
    %8 = arith.mulf %5, %5 : vector<8x128xf32>
    %cst_6 = arith.constant dense<0.000000e+00> : vector<128xf32>
    %9 = vector.multi_reduction <add>, %8, %cst_6 [0] : vector<8x128xf32> to vector<128xf32>
    %10 = vector.shape_cast %9 : vector<128xf32> to vector<1x128xf32>
    %cst_7 = arith.constant 1.250000e-01 : f32
    %11 = vector.broadcast %cst_7 : f32 to vector<1x128xf32>
    %12 = arith.mulf %7, %11 : vector<1x128xf32>
    %cst_8 = arith.constant 1.250000e-01 : f32
    %13 = vector.broadcast %cst_8 : f32 to vector<1x128xf32>
    %14 = arith.mulf %10, %13 : vector<1x128xf32>
    %15 = arith.mulf %12, %12 : vector<1x128xf32>
    %16 = arith.subf %14, %15 : vector<1x128xf32>
    %cst_9 = arith.constant 9.99999974E-6 : f32
    %17 = vector.broadcast %cst_9 : f32 to vector<1x128xf32>
    %18 = arith.addf %16, %17 : vector<1x128xf32>
    %19 = math.rsqrt %18 : vector<1x128xf32>
    %c0_10 = arith.constant 0 : index
    %c0_11 = arith.constant 0 : index
    %20 = vector.load %arg4[%c0_10, %c0_11] : memref<1x128xf32, #tpu.memory_space<vmem>>, vector<1x128xf32>
    %21 = arith.mulf %20, %19 : vector<1x128xf32>
    %c0_12 = arith.constant 0 : index
    %c0_13 = arith.constant 0 : index
    %22 = vector.load %arg5[%c0_12, %c0_13] : memref<1x128xf32, #tpu.memory_space<vmem>>, vector<1x128xf32>
    %23 = arith.mulf %12, %21 : vector<1x128xf32>
    %24 = arith.subf %22, %23 : vector<1x128xf32>
    %25 = vector.broadcast %21 : vector<1x128xf32> to vector<8x128xf32>
    %26 = arith.mulf %5, %25 : vector<8x128xf32>
    %27 = vector.broadcast %24 : vector<1x128xf32> to vector<8x128xf32>
    %28 = arith.addf %26, %27 : vector<8x128xf32>
    %cst_14 = arith.constant 0.000000e+00 : f32
    %29 = vector.broadcast %cst_14 : f32 to vector<8x128xf32>
    %30 = arith.maximumf %28, %29 : vector<8x128xf32>
    %c0_15 = arith.constant 0 : index
    %c0_16 = arith.constant 0 : index
    %31 = vector.load %arg6[%c0_15, %c0_16] : memref<8x128xf32, #tpu.memory_space<vmem>>, vector<8x128xf32>
    tpu.vector_store %arg6[%c0_15, %c0_16], %30 {strides = array<i32>} : memref<8x128xf32, #tpu.memory_space<vmem>>, vector<8x128xf32>,
    return
  }
  func.func @transform_0(%arg0: i32) -> (i32, i32) {
    %c0_i32 = arith.constant 0 : i32
    %c0_i32_0 = arith.constant 0 : i32
    %c0_i32_1 = arith.constant 0 : i32
    return %c0_i32, %c0_i32_0 : i32, i32
  }
  func.func @transform_1(%arg0: i32) -> (i32, i32) {
    %c0_i32 = arith.constant 0 : i32
    %c0_i32_0 = arith.constant 0 : i32
    %c0_i32_1 = arith.constant 0 : i32
    return %c0_i32, %c0_i32_0 : i32, i32
  }
  func.func @transform_2(%arg0: i32) -> (i32, i32) {
    %c0_i32 = arith.constant 0 : i32
    %c0_i32_0 = arith.constant 0 : i32
    %c0_i32_1 = arith.constant 0 : i32
    return %c0_i32, %c0_i32_0 : i32, i32
  }
  func.func @transform_3(%arg0: i32) -> (i32, i32) {
    %c0_i32 = arith.constant 0 : i32
    %c0_i32_0 = arith.constant 0 : i32
    %c0_i32_1 = arith.constant 0 : i32
    return %c0_i32, %c0_i32_0 : i32, i32
  }
  func.func @transform_4(%arg0: i32) -> (i32, i32) {
    %c0_i32 = arith.constant 0 : i32
    %c0_i32_0 = arith.constant 0 : i32
    %c0_i32_1 = arith.constant 0 : i32
    return %c0_i32, %c0_i32_0 : i32, i32
  }
  func.func @transform_5(%arg0: i32) -> (i32, i32) {
    %c0_i32 = arith.constant 0 : i32
    %c0_i32_0 = arith.constant 0 : i32
    %c0_i32_1 = arith.constant 0 : i32
    return %c0_i32, %c0_i32_0 : i32, i32
  }
}

</mosaic_0001>

<bundles_post_ra>
// kernel: net1_forward.1
= control target key start
LH: loop header
LB: loop body
LE: loop exit
PB: predicated region body
PF: predicated region fallthrough
CT: control target
= control target key end

     0   :  { %10 = vsyncpa [#allocation3], 0  ;;  %s378_s0 = inlined_call_operand.vmem [shape: f32[8,32], index: 0, kind: input, shape index: {}]   ;;  %s379_s1 = inlined_call_operand.hbm [shape: f32[32,128], index: 1, kind: input, shape index: {}]   ;;  %s380_s2 = inlined_call_operand.hbm [shape: f32[1,128], index: 2, kind: input, shape index: {}]   ;;  %s381_s3 = inlined_call_operand.vmem [shape: f32[1,128], index: 3, kind: input, shape index: {}]   ;;  %s382_s4 = inlined_call_operand.vmem [shape: f32[1,128], index: 4, kind: input, shape index: {}]   ;;  %s383_s5 = inlined_call_operand.hbm [shape: f32[8,128], index: 5, kind: output, shape index: {}]  }
   0x1   :  { %11 = vsyncpa [#allocation6], 0 }
   0x2   :  { %12 = vsyncpa [#allocation4], 0  ;;  %s295_s18 = smov [#allocation2]   ;;  %s223_s22 = scalar_lea.hbm %s379_s1, 512 }
   0x3   :  { %s20_s19 = sshll.u32 %s295_s18, 4  ;;  %p224_p0 = scmp.ne.s32.totalorder %s379_s1, %s223_s22  ;;  %s21_s19 = int_to_ptr.vmem [resolvable:$true] %s20_s19 }
   0x4   :  { %p227_p1 = scmp.lt.u32.totalorder %s223_s22, %s379_s1 }
   0x6   :  { %p229_p2 = pnand %p227_p1, %p224_p0 }
   0x8   :  { %232 = shalt.err (!%p229_p2)
}
   0x9   :  { %s233_s27 = scalar_lea.vmem %s21_s19, 512  ;;  %p238_p4 = scmp.lt.s32.totalorder %s21_s19, %s21_s19 }
   0xa   :  { %p234_p3 = scmp.ne.s32.totalorder %s21_s19, %s233_s27  ;;  %p239_p5 = scmp.lt.s32.totalorder %s233_s27, %s233_s27 }
   0xc   :  { %p240_p6 = por %p239_p5, %p238_p4 }
   0xe   :  { %p241_p7 = pnand %p240_p6, %p234_p3 }
  0x10   :  { %244 = shalt.err (!%p241_p7)
}
  0x11   :  { %s296_s28 = smov 128   ;;  %s297_s29 = smov 8  }
  0x12   :  { %26 = dma.hbm_to_vmem [thread:$0]  %s379_s1, 512, %s21_s19, [#allocation3], %s296_s28, %s296_s28, %s297_s29  }
  0x13   :  { %s298_s7 = smov [#allocation5]   ;;  %s245_s11 = scalar_lea.hbm %s380_s2, 16 }
  0x14   :  { %s33_s8 = sshll.u32 %s298_s7, 4  ;;  %p246_p8 = scmp.ne.s32.totalorder %s380_s2, %s245_s11  ;;  %s34_s8 = int_to_ptr.vmem [resolvable:$true] %s33_s8 }
  0x15   :  { %p249_p9 = scmp.lt.u32.totalorder %s245_s11, %s380_s2 }
  0x17   :  { %p251_p10 = pnand %p249_p9, %p246_p8 }
  0x19   :  { %254 = shalt.err (!%p251_p10)
}
  0x1a   :  { %s255_s16 = scalar_lea.vmem %s34_s8, 16  ;;  %s259_s1 = scalar_lea.vmem %s34_s8, 32 }
  0x1b   :  { %p256_p11 = scmp.ne.s32.totalorder %s34_s8, %s255_s16  ;;  %p260_p12 = scmp.lt.s32.totalorder %s34_s8, %s34_s8 }
  0x1c   :  { %p261_p13 = scmp.lt.s32.totalorder %s259_s1, %s255_s16 }
  0x1e   :  { %p262_p0 = por %p261_p13, %p260_p12 }
  0x20   :  { %p263_p1 = pnand %p262_p0, %p256_p11 }
  0x22   :  { %266 = shalt.err (!%p263_p1)
}
  0x23   :  { %36 = dma.hbm_to_vmem [thread:$0]  %s380_s2, 16, %s34_s8, [#allocation6]  }
  0x24   :  { %289 = dma.done.wait [#allocation3], 512  }
  0x25   :  { %290 = vsyncadd [#allocation3], 4294966784 }
  0x26   :  { %291 = dma.done.wait [#allocation6], 16  }
  0x27   :  { %292 = vsyncadd [#allocation6], 4294967280  ;;  %v299_v0 = vmov 0.0|0.0   ;;  %vm300_vm0 = vmmov 0   ;;  %v301_v1 = vmov 0.0   ;;  %v48_v2 = vld [vmem:[#allocation2] sm:$0xff]  ;;  %v158_v31 = vlaneseq }
  0x28   :  { %207 = vmatprep.subr.bf16.mxu0 %v299_v0  ;;  %204 = vmatprep.mubr.msk.f32.mxu0 %vm300_vm0, %v301_v1  ;;  %v49_v3 = vld [vmem:[#allocation2 + $0x8] sm:$0xff]  ;;  %v50_v4 = vld [vmem:[#allocation2 + $0x10] sm:$0xff]  ;;  %v51_v6 = vld [vmem:[#allocation2 + $0x18] sm:$0xff]  ;;  %vm59_vm1 = vcmask 261120   ;;  %s302_s23 = smov [#allocation7]  }
  0x29   :  { %v208_v5 = vpack.c.bf16 %v49_v3, %v48_v2  ;;  %v211_v7 = vpack.c.bf16 %v51_v6, %v50_v4  ;;  %v47_v8 = vld [vmem:[%s378_s0] sm:$0xff]  ;;  %v189_v9 = vld [vmem:[#allocation5] ss:$0 sm:$0xff]  ;;  %v159_v32 = vshrl.u32 %v158_v31, 7  ;;  %s179_s24 = sshll.u32 %s302_s23, 4  ;;  %s180_s24 = int_to_ptr.vmem [resolvable:$true] %s179_s24 }
  0x2a   :  { %v152_v33 = vld [vmem:[%s381_s3] sm:$0x1]  ;;  %s267_s25 = scalar_lea.vmem %s180_s24, 128  ;;  %p272_p3 = scmp.lt.s32.totalorder %s180_s24, %s180_s24 }
  0x2b   :  { %209 = vmatpush3.bf16.msra.mxu0 %v208_v5  ;;  %v160_v34 = vsub.s32 0, %v159_v32  ;;  %v154_v37 = vld [vmem:[%s382_s4] sm:$0x1]  ;;  %p268_p2 = scmp.ne.s32.totalorder %s180_s24, %s267_s25  ;;  %p273_p4 = scmp.lt.s32.totalorder %s267_s25, %s267_s25 }
  0x2c   :  { %210 = vmatprep.subr.bf16.mxu0 %v299_v0 }
  0x2d   :  { %p274_p5 = por %p273_p4, %p272_p3 }
  0x2f   :  { %212 = vmatpush3.bf16.msra.mxu0 %v211_v7  ;;  %p275_p6 = pnand %p274_p5, %p268_p2 }
  0x32   :  { %205 = vmatmul.mubr.msk.f32.vlgmr.msra.gmra.mrb[0].mxu0 %vm59_vm1, %v47_v8 }
 0x105   :  { %v129_v10 = vpop.f32.mrb[0].mxu0 }
 0x106   :  { %v130_v11 = vadd.f32 %v189_v9, %v129_v10  ;;  %v206_v12 = vpop.f32.mrb[1].mxu0 }
 0x108   :  { %v133_v13 = vrot.slane %v130_v11, 4  ;;  %v139_v14 = vmul.f32 %v130_v11, %v130_v11 }
 0x10a   :  { %v134_v15 = vadd.f32 %v133_v13, %v130_v11  ;;  %v140_v16 = vrot.slane %v139_v14, 4 }
 0x10c   :  { %v135_v17 = vrot.slane %v134_v15, 2  ;;  %v141_v18 = vadd.f32 %v140_v16, %v139_v14 }
 0x10e   :  { %v136_v19 = vadd.f32 %v135_v17, %v134_v15  ;;  %v142_v20 = vrot.slane %v141_v18, 2 }
 0x110   :  { %v137_v21 = vrot.slane %v136_v19, 1  ;;  %v143_v22 = vadd.f32 %v142_v20, %v141_v18 }
 0x112   :  { %v138_v23 = vadd.f32 %v137_v21, %v136_v19  ;;  %v144_v24 = vrot.slane %v143_v22, 1 }
 0x114   :  { %v145_v25 = vadd.f32 %v144_v24, %v143_v22  ;;  %v146_v26 = vmul.f32 0.125, %v138_v23 }
 0x116   :  { %v147_v27 = vmul.f32 0.125, %v145_v25  ;;  %v148_v28 = vmul.f32 %v146_v26, %v146_v26 }
 0x118   :  { %v149_v29 = vsub.f32 %v147_v27, %v148_v28 }
 0x11a   :  { %v150_v30 = vadd.f32 1e-05, %v149_v29 }
 0x11c   :  { %221 = vrsqrt.f32 %v150_v30 }
 0x126   :  { %v222_v35 = vpop.eup %221 }
 0x127   :  { %v153_v36 = vmul.f32 %v222_v35, %v152_v33 }
 0x129   :  { %v155_v38 = vmul.f32 %v153_v36, %v146_v26  ;;  %v161_v39 = vrot.slane %v153_v36, %v160_v34 }
 0x12b   :  { %v156_v40 = vsub.f32 %v154_v37, %v155_v38  ;;  %v163_v41 = vmul.f32 %v161_v39, %v130_v11 }
 0x12d   :  { %v168_v42 = vrot.slane %v156_v40, %v160_v34 }
 0x12f   :  { %v170_v43 = vadd.f32 %v168_v42, %v163_v41 }
 0x131   :  { %v171_v44 = vmax.f32 %v170_v43, 0.0 }
 0x133   :  { %172 = vst [vmem:[#allocation7] sm:$0xff] %v171_v44 }
 0x134   :  { %278 = shalt.err (!%p275_p6)
}
 0x135   :  { %s279_s26 = scalar_lea.hbm %s383_s5, 128 }
 0x136   :  { %p280_p7 = scmp.ne.s32.totalorder %s383_s5, %s279_s26  ;;  %p283_p8 = scmp.lt.u32.totalorder %s279_s26, %s383_s5 }
 0x138   :  { %p285_p9 = pnand %p283_p8, %p280_p7 }
 0x13a   :  { %288 = shalt.err (!%p285_p9)
}
 0x13b   :  { %182 = dma.vmem_to_hbm [thread:$0]  %s180_s24, 128, %s383_s5, [#allocation4]  }
 0x13c   :  { %293 = dma.done.wait [#allocation4], 128  }
 0x13d   :  { %294 = vsyncadd [#allocation4], 4294967168 }
 0x13e   :  { %186 = vsyncpa [#allocation3], 1 }
 0x13f   :  { %187 = vsyncpa [#allocation6], 1 }
 0x140   :  { %188 = vsyncpa [#allocation4], 1 }

</bundles_post_ra>
